<compile_context>
chip_gen: v5e
topology: v5e:2x2
jax: 0.10.0
libtpu: 0.0.40
codegen_flags: <defaults>
</compile_context>

<pallas_src>
import functools

import jax
import jax.numpy as jnp
from jax.experimental import pallas as pl
from jax.experimental.pallas import tpu as pltpu


def _inverted_attn_kernel(q_ref, k_ref, v_ref, w_ref, out_ref, attn_ref,
                          *, num_heads, epsilon, scale, matmul_dtype):
    # Block shapes (G = b_block * num_heads):
    #   q_ref: (G, Q, D)    k_ref: (G, K, D)    v_ref: (G, K, Dv)
    #   w_ref: (G, Dv, O)   -- per-(batch, head) replica of that head's W slice
    #   out_ref: (b_block, Q, O)      attn_ref: (G, Q, K)
    q = q_ref[...].astype(jnp.float32) * scale            # scaling hoisted, once
    k = k_ref[...]
    v = v_ref[...]
    w = w_ref[...]

    # All (batch, head) pairs of this block in a single batched MXU op.
    logits = jnp.einsum(
        'gqd,gkd->gqk',
        q.astype(matmul_dtype), k.astype(matmul_dtype),
        preferred_element_type=jnp.float32)                # (G, Q, K), f32

    # Inverted attention: softmax over the *query* axis (axis=-2).
    m = jnp.max(logits, axis=-2, keepdims=True)            # (G, 1, K)
    e = jnp.exp(logits - m)
    colsum = jnp.sum(e, axis=-2, keepdims=True)            # (G, 1, K)
    attn = e * pl.reciprocal(colsum, approx=False)         # exact 1/x
    # One store for the whole block (natural [G, Q, K] layout; packing (Q,K)
    # into a 128-lane-dense last dim would require an in-kernel minor-dim
    # reshape/relayout, skipped for lowering robustness at these tiny shapes).
    attn_ref[...] = attn.astype(attn_ref.dtype)

    # Renormalize over keys (norm_type == 'mean').
    norm = jnp.sum(attn, axis=-1, keepdims=True) + epsilon  # (G, Q, 1)
    attn_n = attn * pl.reciprocal(norm, approx=False)

    # Attention-weighted values, all heads at once.
    upd = jnp.einsum(
        'gqk,gkd->gqd',
        attn_n.astype(matmul_dtype), v.astype(matmul_dtype),
        preferred_element_type=jnp.float32)                 # (G, Q, Dv)

    # Fused output projection: batched dot against the replicated per-head
    # weight slice, then reduce over heads (leading-axis split + a few VPU
    # adds; minor dims untouched so no relayout is needed).
    proj = jnp.einsum(
        'gqd,gdo->gqo',
        upd.astype(matmul_dtype), w.astype(matmul_dtype),
        preferred_element_type=jnp.float32)                 # (G, Q, O)
    g, q_num, o_num = proj.shape
    b_block = g // num_heads
    proj = proj.reshape(b_block, num_heads, q_num, o_num)   # leading-dim split
    out = proj[:, 0]
    for h in range(1, num_heads):                           # small static unroll
        out = out + proj[:, h]
    out_ref[...] = out.astype(out_ref.dtype)


def _largest_divisor_not_above(n, cap):
    cap = max(1, min(n, cap))
    for d in range(cap, 0, -1):
        if n % d == 0:
            return d
    return 1


def _choose_batch_block(batch, num_heads, q_num, k_num, qk_dim, v_dim, o_dim,
                        vmem_budget_bytes=8 << 20):
    """How many batch elements to pack per grid step.

    Bigger blocks amortize per-step pipeline overhead and give the MXU larger
    batched operands; the (double-buffered, f32) working-set cap keeps the
    kernel inside the default scoped-VMEM limits on all generations (incl.
    v7x's smaller 64 MiB VMEM)."""
    per_batch_bytes = 8 * num_heads * (
        q_num * qk_dim + k_num * (qk_dim + v_dim) + q_num * k_num
        + q_num * o_dim + v_dim * o_dim) + 8 * q_num * o_dim
    cap = max(1, vmem_budget_bytes // max(per_batch_bytes, 1))
    return _largest_divisor_not_above(batch, cap)


def inverted_dot_product_attention(query, key, value, w_o, *, epsilon=1e-8,
                                   matmul_dtype=jnp.float32):
    """query/key/value: [B, {Q,K}, H, D]; w_o: [H*Dv, O] (pre-transposed
    torch dense_o weight).  Returns (out [B, Q, O], attn [B, H, Q, K])."""
    B, Qn, H, D = query.shape
    Kn = key.shape[1]
    Dv = value.shape[-1]
    O = w_o.shape[-1]
    assert key.shape == (B, Kn, H, D)
    assert value.shape == (B, Kn, H, Dv)
    assert w_o.shape == (H * Dv, O)

    # Free layout plumbing on the XLA side: head-major + (batch, head) flattened
    # so each per-head tile is a contiguous (seq, feat) slab in the kernel.
    qh = jnp.transpose(query, (0, 2, 1, 3)).reshape(B * H, Qn, D)
    kh = jnp.transpose(key, (0, 2, 1, 3)).reshape(B * H, Kn, D)
    vh = jnp.transpose(value, (0, 2, 1, 3)).reshape(B * H, Kn, Dv)

    b_block = _choose_batch_block(B, H, Qn, Kn, D, Dv, O)
    g_block = b_block * H
    grid = (B // b_block,)

    # Per-head projection weight replicated per packed batch element so the
    # in-kernel projection is a single batched dot (row g uses W[g % H]).
    w_rep = jnp.tile(w_o.reshape(H, Dv, O), (b_block, 1, 1))

    kernel = functools.partial(
        _inverted_attn_kernel, num_heads=H, epsilon=epsilon,
        scale=1.0 / (D ** 0.5), matmul_dtype=matmul_dtype)

    out, attn_flat = pl.pallas_call(
        kernel,
        out_shape=(
            jax.ShapeDtypeStruct((B, Qn, O), jnp.float32),
            jax.ShapeDtypeStruct((B * H, Qn, Kn), jnp.float32),
        ),
        grid_spec=pltpu.PrefetchScalarGridSpec(
            num_scalar_prefetch=0,
            grid=grid,
            in_specs=[
                pl.BlockSpec((g_block, Qn, D), lambda i: (i, 0, 0)),
                pl.BlockSpec((g_block, Kn, D), lambda i: (i, 0, 0)),
                pl.BlockSpec((g_block, Kn, Dv), lambda i: (i, 0, 0)),
                pl.BlockSpec((g_block, Dv, O), lambda i: (0, 0, 0)),
            ],
            out_specs=[
                pl.BlockSpec((b_block, Qn, O), lambda i: (i, 0, 0)),
                pl.BlockSpec((g_block, Qn, Kn), lambda i: (i, 0, 0)),
            ],
        ),
        compiler_params=pltpu.CompilerParams(
            dimension_semantics=("parallel",)),
    )(qh, kh, vh, w_rep)

    return out, attn_flat.reshape(B, H, Qn, Kn)


def _reference(query, key, value, w_o, epsilon=1e-8):
    """Pure-JAX mirror of the PyTorch forward (for verification)."""
    D = query.shape[-1]
    q = query / (D ** 0.5)
    attn = jnp.einsum('bqhd,bkhd->bhqk', q, key)
    attn = jax.nn.softmax(attn, axis=-2)                     # inverted: over Q
    norm = jnp.sum(attn, axis=-1, keepdims=True) + epsilon   # renormalize keys
    attn_n = attn / norm
    upd = jnp.einsum('bhqk,bkhd->bqhd', attn_n, value)
    B, Qn = query.shape[:2]
    out = upd.reshape(B, Qn, -1) @ w_o
    return out, attn


if __name__ == "__main__":
    # Module config: input_size=32, output_size=32, num_heads=4, norm_type='mean'
    B, Qn, Kn = 2, 8, 16
    H, D = 4, 8                 # head_dim = input_size // num_heads = 8
    input_size = H * D          # 32
    output_size = 32
    eps = 1e-8

    key0 = jax.random.PRNGKey(0)
    kq, kk, kv, kw = jax.random.split(key0, 4)
    query = jax.random.normal(kq, (B, Qn, H, D), dtype=jnp.float32)
    keyt = jax.random.normal(kk, (B, Kn, H, D), dtype=jnp.float32)
    value = jax.random.normal(kv, (B, Kn, H, D), dtype=jnp.float32)

    # torch nn.Linear(input_size, output_size, bias=False): weight [out, in].
    # Deterministic synthetic init; pre-transpose to [in, out] for the kernel.
    w_torch = jax.random.normal(kw, (output_size, input_size),
                                dtype=jnp.float32) * (1.0 / input_size ** 0.5)
    w_o = w_torch.T

    out, attn = inverted_dot_product_attention(query, keyt, value, w_o,
                                               epsilon=eps)
    jax.block_until_ready((out, attn))

    out_ref, attn_ref = _reference(query, keyt, value, w_o, epsilon=eps)
    assert out.shape == (B, Qn, output_size)
    assert attn.shape == (B, H, Qn, Kn)
    assert jnp.allclose(out, out_ref, atol=1e-4, rtol=1e-4), float(
        jnp.max(jnp.abs(out - out_ref)))
    assert jnp.allclose(attn, attn_ref, atol=1e-5, rtol=1e-5), float(
        jnp.max(jnp.abs(attn - attn_ref)))

    print("KERNEL_OK")
</pallas_src>

<mosaic_0001>
module attributes {stable_mosaic.version = 11 : i64} {
  func.func @_inverted_attn_kernel(%arg0: i32, %arg1: memref<8x8x8xf32, #tpu.memory_space<vmem>>, %arg2: memref<8x16x8xf32, #tpu.memory_space<vmem>>, %arg3: memref<8x16x8xf32, #tpu.memory_space<vmem>>, %arg4: memref<8x8x32xf32, #tpu.memory_space<vmem>>, %arg5: memref<2x8x32xf32, #tpu.memory_space<vmem>>, %arg6: memref<8x8x16xf32, #tpu.memory_space<vmem>>) attributes {dimension_semantics = [#tpu.dimension_semantics<parallel>], iteration_bounds = array<i64: 1>, scalar_prefetch = 0 : i64, scratch_operands = 0 : i64, tpu.core_type = #tpu.core_type<tc>, window_params = [{transform_indices = @transform_0, window_bounds = array<i64: 8, 8, 8>}, {transform_indices = @transform_1, window_bounds = array<i64: 8, 16, 8>}, {transform_indices = @transform_2, window_bounds = array<i64: 8, 16, 8>}, {pipeline_mode = #tpu.pipeline_mode<synchronous>, transform_indices = @transform_3, window_bounds = array<i64: 8, 8, 32>}, {transform_indices = @transform_4, window_bounds = array<i64: 2, 8, 32>}, {transform_indices = @transform_5, window_bounds = array<i64: 8, 8, 16>}]} {
    %c0 = arith.constant 0 : index
    %c0_0 = arith.constant 0 : index
    %c0_1 = arith.constant 0 : index
    %0 = vector.load %arg1[%c0, %c0_0, %c0_1] : memref<8x8x8xf32, #tpu.memory_space<vmem>>, vector<8x8x8xf32>
    %cst = arith.constant 0.353553385 : f32
    %1 = vector.broadcast %cst : f32 to vector<8x8x8xf32>
    %2 = arith.mulf %0, %1 : vector<8x8x8xf32>
    %c0_2 = arith.constant 0 : index
    %c0_3 = arith.constant 0 : index
    %c0_4 = arith.constant 0 : index
    %3 = vector.load %arg2[%c0_2, %c0_3, %c0_4] : memref<8x16x8xf32, #tpu.memory_space<vmem>>, vector<8x16x8xf32>
    %c0_5 = arith.constant 0 : index
    %c0_6 = arith.constant 0 : index
    %c0_7 = arith.constant 0 : index
    %4 = vector.load %arg3[%c0_5, %c0_6, %c0_7] : memref<8x16x8xf32, #tpu.memory_space<vmem>>, vector<8x16x8xf32>
    %c0_8 = arith.constant 0 : index
    %c0_9 = arith.constant 0 : index
    %c0_10 = arith.constant 0 : index
    %5 = vector.load %arg4[%c0_8, %c0_9, %c0_10] : memref<8x8x32xf32, #tpu.memory_space<vmem>>, vector<8x8x32xf32>
    "tpu.trace_start"() <{level = 10 : i32, message = "gqd,gkd->gqk"}> : () -> ()
    %cst_11 = arith.constant dense<0.000000e+00> : vector<8x8x16xf32>
    %6 = tpu.matmul %2, %3, %cst_11 {dimension_numbers = #tpu.dot_dimension_numbers<[2], [2], [1], [1], [0, 0, 0, 1, 1, 1], [0], [0]>} : vector<8x8x8xf32>, vector<8x16x8xf32>, vector<8x8x16xf32> -> vector<8x8x16xf32>
    "tpu.trace_stop"() : () -> ()
    %cst_12 = arith.constant dense<0xFF800000> : vector<8x16xf32>
    %7 = vector.multi_reduction <maximumf>, %6, %cst_12 [1] : vector<8x8x16xf32> to vector<8x16xf32>
    %8 = vector.shape_cast %7 : vector<8x16xf32> to vector<8x1x16xf32>
    %9 = vector.broadcast %8 : vector<8x1x16xf32> to vector<8x8x16xf32>
    %10 = arith.subf %6, %9 : vector<8x8x16xf32>
    %11 = math.exp %10 : vector<8x8x16xf32>
    %cst_13 = arith.constant dense<0.000000e+00> : vector<8x16xf32>
    %12 = vector.multi_reduction <add>, %11, %cst_13 [1] : vector<8x8x16xf32> to vector<8x16xf32>
    %13 = vector.shape_cast %12 : vector<8x16xf32> to vector<8x1x16xf32>
    %14 = tpu.reciprocal %13 : vector<8x1x16xf32> -> vector<8x1x16xf32>
    %15 = vector.broadcast %14 : vector<8x1x16xf32> to vector<8x8x16xf32>
    %16 = arith.mulf %11, %15 : vector<8x8x16xf32>
    %c0_14 = arith.constant 0 : index
    %c0_15 = arith.constant 0 : index
    %c0_16 = arith.constant 0 : index
    %17 = vector.load %arg6[%c0_14, %c0_15, %c0_16] : memref<8x8x16xf32, #tpu.memory_space<vmem>>, vector<8x8x16xf32>
    tpu.vector_store %arg6[%c0_14, %c0_15, %c0_16], %16 {strides = array<i32>} : memref<8x8x16xf32, #tpu.memory_space<vmem>>, vector<8x8x16xf32>,
    %cst_17 = arith.constant dense<0.000000e+00> : vector<8x8xf32>
    %18 = vector.multi_reduction <add>, %16, %cst_17 [2] : vector<8x8x16xf32> to vector<8x8xf32>
    %19 = vector.shape_cast %18 : vector<8x8xf32> to vector<8x8x1xf32>
    %cst_18 = arith.constant 9.99999993E-9 : f32
    %20 = vector.broadcast %cst_18 : f32 to vector<8x8x1xf32>
    %21 = arith.addf %19, %20 : vector<8x8x1xf32>
    %22 = tpu.reciprocal %21 : vector<8x8x1xf32> -> vector<8x8x1xf32>
    %23 = vector.broadcast %22 : vector<8x8x1xf32> to vector<8x8x16xf32>
    %24 = arith.mulf %16, %23 : vector<8x8x16xf32>
    "tpu.trace_start"() <{level = 10 : i32, message = "gqk,gkd->gqd"}> : () -> ()
    %cst_19 = arith.constant dense<0.000000e+00> : vector<8x8x8xf32>
    %25 = tpu.matmul %24, %4, %cst_19 {dimension_numbers = #tpu.dot_dimension_numbers<[2], [1], [1], [2], [0, 0, 0, 1, 1, 2], [0], [0]>} : vector<8x8x16xf32>, vector<8x16x8xf32>, vector<8x8x8xf32> -> vector<8x8x8xf32>
    "tpu.trace_stop"() : () -> ()
    "tpu.trace_start"() <{level = 10 : i32, message = "gqd,gdo->gqo"}> : () -> ()
    %cst_20 = arith.constant dense<0.000000e+00> : vector<8x8x32xf32>
    %26 = tpu.matmul %25, %5, %cst_20 {dimension_numbers = #tpu.dot_dimension_numbers<[2], [1], [1], [2], [0, 0, 0, 1, 1, 2], [0], [0]>} : vector<8x8x8xf32>, vector<8x8x32xf32>, vector<8x8x32xf32> -> vector<8x8x32xf32>
    "tpu.trace_stop"() : () -> ()
    %27 = vector.shape_cast %26 : vector<8x8x32xf32> to vector<2x4x8x32xf32>
    %28 = vector.extract_strided_slice %27 {offsets = [0, 0, 0, 0], sizes = [2, 1, 8, 32], strides = [1, 1, 1, 1]} : vector<2x4x8x32xf32> to vector<2x1x8x32xf32>
    %29 = vector.shape_cast %28 : vector<2x1x8x32xf32> to vector<2x8x32xf32>
    %30 = vector.extract_strided_slice %27 {offsets = [0, 1, 0, 0], sizes = [2, 1, 8, 32], strides = [1, 1, 1, 1]} : vector<2x4x8x32xf32> to vector<2x1x8x32xf32>
    %31 = vector.shape_cast %30 : vector<2x1x8x32xf32> to vector<2x8x32xf32>
    %32 = arith.addf %29, %31 : vector<2x8x32xf32>
    %33 = vector.extract_strided_slice %27 {offsets = [0, 2, 0, 0], sizes = [2, 1, 8, 32], strides = [1, 1, 1, 1]} : vector<2x4x8x32xf32> to vector<2x1x8x32xf32>
    %34 = vector.shape_cast %33 : vector<2x1x8x32xf32> to vector<2x8x32xf32>
    %35 = arith.addf %32, %34 : vector<2x8x32xf32>
    %36 = vector.extract_strided_slice %27 {offsets = [0, 3, 0, 0], sizes = [2, 1, 8, 32], strides = [1, 1, 1, 1]} : vector<2x4x8x32xf32> to vector<2x1x8x32xf32>
    %37 = vector.shape_cast %36 : vector<2x1x8x32xf32> to vector<2x8x32xf32>
    %38 = arith.addf %35, %37 : vector<2x8x32xf32>
    %c0_21 = arith.constant 0 : index
    %c0_22 = arith.constant 0 : index
    %c0_23 = arith.constant 0 : index
    %39 = vector.load %arg5[%c0_21, %c0_22, %c0_23] : memref<2x8x32xf32, #tpu.memory_space<vmem>>, vector<2x8x32xf32>
    tpu.vector_store %arg5[%c0_21, %c0_22, %c0_23], %38 {strides = array<i32>} : memref<2x8x32xf32, #tpu.memory_space<vmem>>, vector<2x8x32xf32>,
    return
  }
  func.func @transform_0(%arg0: i32) -> (i32, i32, i32) {
    %c0_i32 = arith.constant 0 : i32
    %c0_i32_0 = arith.constant 0 : i32
    %c0_i32_1 = arith.constant 0 : i32
    return %arg0, %c0_i32, %c0_i32_0 : i32, i32, i32
  }
  func.func @transform_1(%arg0: i32) -> (i32, i32, i32) {
    %c0_i32 = arith.constant 0 : i32
    %c0_i32_0 = arith.constant 0 : i32
    %c0_i32_1 = arith.constant 0 : i32
    return %arg0, %c0_i32, %c0_i32_0 : i32, i32, i32
  }
  func.func @transform_2(%arg0: i32) -> (i32, i32, i32) {
    %c0_i32 = arith.constant 0 : i32
    %c0_i32_0 = arith.constant 0 : i32
    %c0_i32_1 = arith.constant 0 : i32
    return %arg0, %c0_i32, %c0_i32_0 : i32, i32, i32
  }
  func.func @transform_3(%arg0: i32) -> (i32, i32, i32) {
    %c0_i32 = arith.constant 0 : i32
    %c0_i32_0 = arith.constant 0 : i32
    %c0_i32_1 = arith.constant 0 : i32
    %c0_i32_2 = arith.constant 0 : i32
    return %c0_i32, %c0_i32_0, %c0_i32_1 : i32, i32, i32
  }
  func.func @transform_4(%arg0: i32) -> (i32, i32, i32) {
    %c0_i32 = arith.constant 0 : i32
    %c0_i32_0 = arith.constant 0 : i32
    %c0_i32_1 = arith.constant 0 : i32
    return %arg0, %c0_i32, %c0_i32_0 : i32, i32, i32
  }
  func.func @transform_5(%arg0: i32) -> (i32, i32, i32) {
    %c0_i32 = arith.constant 0 : i32
    %c0_i32_0 = arith.constant 0 : i32
    %c0_i32_1 = arith.constant 0 : i32
    return %arg0, %c0_i32, %c0_i32_0 : i32, i32, i32
  }
}

</mosaic_0001>

<bundles_post_ra>
// kernel: tpu_custom_call.1
= control target key start
LH: loop header
LB: loop body
LE: loop exit
PB: predicated region body
PF: predicated region fallthrough
CT: control target
= control target key end

     0   :  { %11 = vsyncpa [#allocation3], 0  ;;  %vm77_vm0 = vcmask 64512   ;;  %s1848_s0 = inlined_call_operand.vmem [shape: f32[8,8,8], index: 0, kind: input, shape index: {}]   ;;  %s1849_s1 = inlined_call_operand.vmem [shape: f32[8,16,8], index: 1, kind: input, shape index: {}]   ;;  %s1850_s2 = inlined_call_operand.vmem [shape: f32[8,16,8], index: 2, kind: input, shape index: {}]   ;;  %s1851_s3 = inlined_call_operand.vmem [shape: f32[8,8,32], index: 3, kind: input, shape index: {}]   ;;  %s1852_s4 = inlined_call_operand.hbm [shape: f32[2,8,32], index: 4, kind: output, shape index: {0}]   ;;  %s1853_s5 = inlined_call_operand.hbm [shape: f32[8,8,16], index: 5, kind: output, shape index: {1}]  }
   0x1   :  { %v38_v0 = vld [vmem:[%s1849_s1 + $0x8] sm:$0xff]  ;;  %v40_v1 = vld [vmem:[%s1849_s1 + $0x18] sm:$0xff]  ;;  %v37_v4 = vld [vmem:[%s1849_s1] sm:$0xff] }
   0x2   :  { %v42_v2 = vld [vmem:[%s1849_s1 + $0x28] sm:$0xff]  ;;  %1140 = vmatpush.xpose.msk.msra.mxu0 %vm77_vm0, %v38_v0  ;;  %1143 = vmatpush.xpose.msk.msra.mxu1 %vm77_vm0, %v40_v1  ;;  %v44_v3 = vld [vmem:[%s1849_s1 + $0x38] sm:$0xff]  ;;  %v39_v5 = vld [vmem:[%s1849_s1 + $0x10] sm:$0xff] }
   0x3   :  { %1146 = vmatpush.xpose.msk.msra.mxu2 %vm77_vm0, %v42_v2  ;;  %1149 = vmatpush.xpose.msk.msra.mxu3 %vm77_vm0, %v44_v3  ;;  %v41_v6 = vld [vmem:[%s1849_s1 + $0x20] sm:$0xff]  ;;  %v43_v7 = vld [vmem:[%s1849_s1 + $0x30] sm:$0xff]  ;;  %v22_v9 = vld [vmem:[%s1848_s0 + $0x8] sm:$0xff] }
   0x4   :  { %v21_v8 = vld [vmem:[%s1848_s0] sm:$0xff]  ;;  %v23_v10 = vld [vmem:[%s1848_s0 + $0x10] sm:$0xff]  ;;  %v24_v11 = vld [vmem:[%s1848_s0 + $0x18] sm:$0xff]  ;;  %v30_v13 = vmul.f32 0.35355338, %v22_v9 }
   0x5   :  { %v29_v12 = vmul.f32 0.35355338, %v21_v8  ;;  %v31_v14 = vmul.f32 0.35355338, %v23_v10  ;;  %v32_v15 = vmul.f32 0.35355338, %v24_v11 }
   0x6   :  { %1141 = vmatpush.xpose.msk.msra.mxu0 %vm77_vm0, %v37_v4  ;;  %1144 = vmatpush.xpose.msk.msra.mxu1 %vm77_vm0, %v39_v5  ;;  %v50_v16 = vld [vmem:[%s1849_s1 + $0x68] sm:$0xff]  ;;  %v48_v18 = vld [vmem:[%s1849_s1 + $0x58] sm:$0xff]  ;;  %v49_v20 = vld [vmem:[%s1849_s1 + $0x60] sm:$0xff] }
   0x7   :  { %v46_v17 = vld [vmem:[%s1849_s1 + $0x48] sm:$0xff]  ;;  %1147 = vmatpush.xpose.msk.msra.mxu2 %vm77_vm0, %v41_v6  ;;  %1150 = vmatpush.xpose.msk.msra.mxu3 %vm77_vm0, %v43_v7  ;;  %v52_v19 = vld [vmem:[%s1849_s1 + $0x78] sm:$0xff]  ;;  %v45_v21 = vld [vmem:[%s1849_s1 + $0x40] sm:$0xff] }
   0x8   :  { %v25_v22 = vld [vmem:[%s1848_s0 + $0x20] sm:$0xff]  ;;  %v26_v23 = vld [vmem:[%s1848_s0 + $0x28] sm:$0xff]  ;;  %v27_v24 = vld [vmem:[%s1848_s0 + $0x30] sm:$0xff] }
   0x9   :  { %1142 = vmatmul.msk.f32.vlgmr.msra.gmra.mxu0 %vm77_vm0, %v29_v12  ;;  %1145 = vmatmul.msk.f32.vlgmr.msra.gmra.mxu1 %vm77_vm0, %v30_v13 }
   0xa   :  { %1152 = vmatpush.xpose.msk.msrb.mxu0 %vm77_vm0, %v46_v17  ;;  %1148 = vmatmul.msk.f32.vlgmr.msra.gmra.mxu2 %vm77_vm0, %v31_v14 }
   0xb   :  { %1158 = vmatpush.xpose.msk.msrb.mxu2 %vm77_vm0, %v50_v16  ;;  %1151 = vmatmul.msk.f32.vlgmr.msra.gmra.mxu3 %vm77_vm0, %v32_v15 }
   0xc   :  { %1155 = vmatpush.xpose.msk.msrb.mxu1 %vm77_vm0, %v48_v18  ;;  %1161 = vmatpush.xpose.msk.msrb.mxu3 %vm77_vm0, %v52_v19 }
   0xd   :  { %12 = vsyncpa [#allocation5], 0  ;;  %v47_v25 = vld [vmem:[%s1849_s1 + $0x50] sm:$0xff]  ;;  %v28_v27 = vld [vmem:[%s1848_s0 + $0x38] sm:$0xff]  ;;  %v33_v28 = vmul.f32 0.35355338, %v25_v22 }
   0xe   :  { %1153 = vmatpush.xpose.msk.msrb.mxu0 %vm77_vm0, %v45_v21  ;;  %v51_v26 = vld [vmem:[%s1849_s1 + $0x70] sm:$0xff]  ;;  %v34_v29 = vmul.f32 0.35355338, %v26_v23  ;;  %v35_v30 = vmul.f32 0.35355338, %v27_v24  ;;  %vm310_vm1 = vcmask 130048  }
   0xf   :  { %1159 = vmatpush.xpose.msk.msrb.mxu2 %vm77_vm0, %v49_v20  ;;  %v36_v31 = vmul.f32 0.35355338, %v28_v27  ;;  %s1123_s12 = sshll.u32 %s1853_s5, 4  ;;  %s1285_s13 = smov 128   ;;  %s1124_s12 = int_to_ptr.hbm [resolvable:$true] %s1123_s12 }
  0x10   :  { %1156 = vmatpush.xpose.msk.msrb.mxu1 %vm77_vm0, %v47_v25  ;;  %1162 = vmatpush.xpose.msk.msrb.mxu3 %vm77_vm0, %v51_v26  ;;  %s1286_s14 = smov 8   ;;  %s1287_s15 = smov [#allocation2]  }
  0x11   :  { %1154 = vmatmul.msk.f32.vlgmr.msrb.gmra.mxu0 %vm77_vm0, %v33_v28  ;;  %s1108_s5 = sshll.u32 %s1287_s15, 4  ;;  %s1110_s16 = sshll.u32 %s1852_s4, 4  ;;  %s1109_s5 = int_to_ptr.vmem [resolvable:$true] %s1108_s5  ;;  %s1111_s16 = int_to_ptr.hbm [resolvable:$true] %s1110_s16 }
  0x12   :  { %1160 = vmatmul.msk.f32.vlgmr.msrb.gmra.mxu2 %vm77_vm0, %v35_v30 }
  0x13   :  { %1157 = vmatmul.msk.f32.vlgmr.msrb.gmra.mxu1 %vm77_vm0, %v34_v29  ;;  %1163 = vmatmul.msk.f32.vlgmr.msrb.gmra.mxu3 %vm77_vm0, %v36_v31 }
  0x86   :  { %v104_v32 = vpop.f32.mrf.mxu0  ;;  %v133_v33 = vpop.f32.mrf.mxu1 }
  0x87   :  { %v311_v34 = vsel %vm310_vm1, %v104_v32, -inf  ;;  %v318_v35 = vsel %vm310_vm1, %v133_v33, -inf }
  0x88   :  { %v312_v36 = vrot.slane %v311_v34, 4  ;;  %v319_v37 = vrot.slane %v318_v35, 4 }
  0x8a   :  { %v313_v38 = vmax.f32 %v311_v34, %v312_v36  ;;  %v320_v39 = vmax.f32 %v318_v35, %v319_v37 }
  0x8c   :  { %v314_v40 = vrot.slane %v313_v38, 2  ;;  %v321_v41 = vrot.slane %v320_v39, 2 }
  0x8d   :  { %v162_v42 = vpop.f32.mrf.mxu2 }
  0x8e   :  { %v191_v43 = vpop.f32.mrf.mxu3  ;;  %v315_v44 = vmax.f32 %v313_v38, %v314_v40  ;;  %v322_v45 = vmax.f32 %v320_v39, %v321_v41  ;;  %v325_v46 = vsel %vm310_vm1, %v162_v42, -inf  ;;  %v220_v48 = vpop.f32.mrf.mxu0 }
  0x8f   :  { %v332_v47 = vsel %vm310_vm1, %v191_v43, -inf  ;;  %v326_v49 = vrot.slane %v325_v46, 4  ;;  %v339_v51 = vsel %vm310_vm1, %v220_v48, -inf }
  0x90   :  { %v333_v50 = vrot.slane %v332_v47, 4  ;;  %v249_v52 = vpop.f32.mrf.mxu1  ;;  %v316_v53 = vrot.slane %v315_v44, 1  ;;  %v323_v54 = vrot.slane %v322_v45, 1  ;;  %v340_v55 = vrot.slane %v339_v51, 4 }
  0x91   :  { %v346_v56 = vsel %vm310_vm1, %v249_v52, -inf  ;;  %v327_v57 = vmax.f32 %v325_v46, %v326_v49 }
  0x92   :  { %v334_v58 = vmax.f32 %v332_v47, %v333_v50  ;;  %v347_v59 = vrot.slane %v346_v56, 4  ;;  %v317_v60 = vmax.f32 %v315_v44, %v316_v53  ;;  %v324_v61 = vmax.f32 %v322_v45, %v323_v54 }
  0x93   :  { %v341_v62 = vmax.f32 %v339_v51, %v340_v55  ;;  %v328_v63 = vrot.slane %v327_v57, 2 }
  0x94   :  { %v335_v0 = vrot.slane %v334_v58, 2  ;;  %v348_v1 = vmax.f32 %v346_v56, %v347_v59  ;;  %v367_v2 = vsub.f32 %v104_v32, %v317_v60  ;;  %v368_v3 = vsub.f32 %v133_v33, %v324_v61 }
  0x95   :  { %v342_v4 = vrot.slane %v341_v62, 2  ;;  %v329_v5 = vmax.f32 %v327_v57, %v328_v63  ;;  %v278_v8 = vpop.f32.mrf.mxu2 }
  0x96   :  { %v336_v6 = vmax.f32 %v334_v58, %v335_v0  ;;  %v349_v7 = vrot.slane %v348_v1, 2  ;;  %v375_v9 = vmul.f32 1.442695, %v367_v2  ;;  %v377_v10 = vmul.f32 1.442695, %v368_v3  ;;  %v1421_v13 = vpop.f32.mrf.mxu3 }
  0x97   :  { %v343_v11 = vmax.f32 %v341_v62, %v342_v4  ;;  %v353_v12 = vsel %vm310_vm1, %v278_v8, -inf  ;;  %v330_v14 = vrot.slane %v329_v5, 1  ;;  %v360_v19 = vsel %vm310_vm1, %v1421_v13, -inf }
  0x98   :  { %v337_v15 = vrot.slane %v336_v6, 1  ;;  %v350_v16 = vmax.f32 %v348_v1, %v349_v7  ;;  %v354_v17 = vrot.slane %v353_v12, 4  ;;  %1184 = vpow2.f32 %v375_v9 }
  0x99   :  { %v344_v18 = vrot.slane %v343_v11, 1  ;;  %1186 = vpow2.f32 %v377_v10  ;;  %v331_v20 = vmax.f32 %v329_v5, %v330_v14  ;;  %v361_v25 = vrot.slane %v360_v19, 4 }
  0x9a   :  { %v338_v21 = vmax.f32 %v336_v6, %v337_v15  ;;  %v351_v22 = vrot.slane %v350_v16, 1  ;;  %v355_v24 = vmax.f32 %v353_v12, %v354_v17 }
  0x9b   :  { %v345_v23 = vmax.f32 %v343_v11, %v344_v18  ;;  %v369_v26 = vsub.f32 %v162_v42, %v331_v20  ;;  %v362_v31 = vmax.f32 %v360_v19, %v361_v25 }
  0x9c   :  { %v370_v27 = vsub.f32 %v191_v43, %v338_v21  ;;  %v352_v28 = vmax.f32 %v350_v16, %v351_v22  ;;  %v356_v30 = vrot.slane %v355_v24, 2 }
  0x9d   :  { %v371_v29 = vsub.f32 %v220_v48, %v345_v23  ;;  %v379_v32 = vmul.f32 1.442695, %v369_v26  ;;  %v363_v38 = vrot.slane %v362_v31, 2 }
  0x9e   :  { %v381_v33 = vmul.f32 1.442695, %v370_v27  ;;  %v372_v34 = vsub.f32 %v249_v52, %v352_v28  ;;  %v1425_v35 = vpop.eup %1184  ;;  %v357_v37 = vmax.f32 %v355_v24, %v356_v30 }
  0x9f   :  { %v383_v36 = vmul.f32 1.442695, %v371_v29  ;;  %v1427_v39 = vpop.eup %1186  ;;  %v391_v40 = vsel %vm310_vm1, %v1425_v35, 0.0  ;;  %1188 = vpow2.f32 %v379_v32  ;;  %v364_v46 = vmax.f32 %v362_v31, %v363_v38 }
  0xa0   :  { %v385_v41 = vmul.f32 1.442695, %v372_v34  ;;  %v392_v42 = vrot.slane %v391_v40, 4  ;;  %v398_v43 = vsel %vm310_vm1, %v1427_v39, 0.0  ;;  %1190 = vpow2.f32 %v381_v33 }
  0xa1   :  { %v358_v44 = vrot.slane %v357_v37, 1  ;;  %v399_v45 = vrot.slane %v398_v43, 4  ;;  %1192 = vpow2.f32 %v383_v36  ;;  %v365_v50 = vrot.slane %v364_v46, 1 }
  0xa2   :  { %v393_v47 = vadd.f32 %v392_v42, %v391_v40  ;;  %1194 = vpow2.f32 %v385_v41 }
  0xa3   :  { %v359_v48 = vmax.f32 %v357_v37, %v358_v44  ;;  %v400_v49 = vadd.f32 %v399_v45, %v398_v43  ;;  %v366_v55 = vmax.f32 %v364_v46, %v365_v50 }
  0xa4   :  { %v394_v51 = vrot.slane %v393_v47, 2 }
  0xa5   :  { %v373_v52 = vsub.f32 %v278_v8, %v359_v48  ;;  %v1433_v53 = vpop.eup %1188  ;;  %v401_v54 = vrot.slane %v400_v49, 2  ;;  %v374_v0 = vsub.f32 %v1421_v13, %v366_v55 }
  0xa6   :  { %v1435_v56 = vpop.eup %1190  ;;  %v395_v57 = vadd.f32 %v394_v51, %v393_v47  ;;  %v405_v58 = vsel %vm310_vm1, %v1433_v53, 0.0 }
  0xa7   :  { %v387_v59 = vmul.f32 1.442695, %v373_v52  ;;  %v1439_v60 = vpop.eup %1192  ;;  %v402_v61 = vadd.f32 %v401_v54, %v400_v49  ;;  %v406_v62 = vrot.slane %v405_v58, 4  ;;  %v412_v63 = vsel %vm310_vm1, %v1435_v56, 0.0 }
  0xa8   :  { %v1444_v1 = vpop.eup %1194  ;;  %v396_v2 = vrot.slane %v395_v57, 1  ;;  %v413_v3 = vrot.slane %v412_v63, 4  ;;  %v419_v4 = vsel %vm310_vm1, %v1439_v60, 0.0  ;;  %v389_v11 = vmul.f32 1.442695, %v374_v0 }
  0xa9   :  { %1196 = vpow2.f32 %v387_v59  ;;  %v403_v5 = vrot.slane %v402_v61, 1  ;;  %v407_v6 = vadd.f32 %v406_v62, %v405_v58  ;;  %v420_v7 = vrot.slane %v419_v4, 4 }
  0xaa   :  { %v426_v8 = vsel %vm310_vm1, %v1444_v1, 0.0  ;;  %v414_v9 = vadd.f32 %v413_v3, %v412_v63  ;;  %v1450_v12 = vadd.f32 %v396_v2, %v395_v57 }
  0xab   :  { %v427_v10 = vrot.slane %v426_v8, 4  ;;  %v404_v13 = vadd.f32 %v403_v5, %v402_v61  ;;  %v408_v14 = vrot.slane %v407_v6, 2  ;;  %v421_v15 = vadd.f32 %v420_v7, %v419_v4 }
  0xac   :  { %v415_v16 = vrot.slane %v414_v9, 2  ;;  %v456_v52 = vand.u32 2147483647, %v1450_v12  ;;  %v458_v54 = vand.u32 2147483648, %v1450_v12  ;;  %vm452_vm9 = vweird.f32 %v1450_v12 }
  0xad   :  { %v428_v17 = vadd.f32 %v427_v10, %v426_v8  ;;  %1198 = vrcp.f32 %v404_v13  ;;  %v409_v18 = vadd.f32 %v408_v14, %v407_v6  ;;  %v422_v19 = vrot.slane %v421_v15, 2 }
  0xae   :  { %v416_v21 = vadd.f32 %v415_v16, %v414_v9  ;;  %1200 = vpow2.f32 %v389_v11  ;;  %v470_v31 = vand.u32 2147483647, %v404_v13  ;;  %v472_v32 = vand.u32 2147483648, %v404_v13 }
  0xaf   :  { %v1452_v20 = vpop.eup %1196  ;;  %v429_v22 = vrot.slane %v428_v17, 2  ;;  %1202 = vrcp.f32 %v1450_v12  ;;  %v410_v23 = vrot.slane %v409_v18, 1  ;;  %v423_v24 = vadd.f32 %v422_v19, %v421_v15 }
  0xb0   :  { %v433_v25 = vsel %vm310_vm1, %v1452_v20, 0.0  ;;  %v417_v26 = vrot.slane %v416_v21, 1  ;;  %vm466_vm2 = vweird.f32 %v404_v13  ;;  %vm1473_vm3 = vcmp.eq.f32.partialorder %v470_v31, 8.507059e+37 }
  0xb1   :  { %v430_v27 = vadd.f32 %v429_v22, %v428_v17  ;;  %v434_v28 = vrot.slane %v433_v25, 4  ;;  %v1457_v29 = vadd.f32 %v410_v23, %v409_v18  ;;  %v424_v30 = vrot.slane %v423_v24, 1 }
  0xb2   :  { %v1459_v33 = vadd.f32 %v417_v26, %v416_v21  ;;  %v473_v47 = vor.u32 1.1754944e-38, %v472_v32 }
  0xb3   :  { %v431_v34 = vrot.slane %v430_v27, 1  ;;  %v435_v36 = vadd.f32 %v434_v28, %v433_v25  ;;  %v1199_v37 = vpop.eup %1198  ;;  %1204 = vrcp.f32 %v1457_v29  ;;  %v1462_v38 = vadd.f32 %v424_v30, %v423_v24 }
  0xb4   :  { %v1464_v40 = vpop.eup %1200  ;;  %1206 = vrcp.f32 %v1459_v33  ;;  %v462_v42 = vmul.f32 %v1199_v37, %v404_v13  ;;  %v484_v51 = vand.u32 2147483647, %v1457_v29  ;;  %vm467_vm4 = vweird.f32 %v1199_v37 }
  0xb5   :  { %v436_v41 = vrot.slane %v435_v36, 2  ;;  %v1467_v43 = vpop.eup %1202  ;;  %v1469_v44 = vadd.f32 %v431_v34, %v430_v27  ;;  %v440_v45 = vsel %vm310_vm1, %v1464_v40, 0.0  ;;  %1208 = vrcp.f32 %v1462_v38  ;;  %vm468_vm7 = vmor %vm466_vm2, %vm467_vm4 }
  0xb6   :  { %v441_v49 = vrot.slane %v440_v45, 4  ;;  %v463_v50 = vsub.f32 1.0, %v462_v42  ;;  %v448_v59 = vmul.f32 %v1467_v43, %v1450_v12  ;;  %vm480_vm5 = vweird.f32 %v1457_v29 }
  0xb7   :  { %v437_v48 = vadd.f32 %v436_v41, %v435_v36  ;;  %1210 = vrcp.f32 %v1469_v44  ;;  %v486_v62 = vand.u32 2147483648, %v1457_v29  ;;  %v498_v63 = vand.u32 2147483647, %v1459_v33 }
  0xb8   :  { %v442_v57 = vadd.f32 %v441_v49, %v440_v45  ;;  %v464_v58 = vmul.f32 %v1199_v37, %v463_v50  ;;  %vm1490_vm6 = vcmp.eq.f32.partialorder %v484_v51, 8.507059e+37  ;;  %vm494_vm8 = vweird.f32 %v1459_v33 }
  0xb9   :  { %v438_v55 = vrot.slane %v437_v48, 1  ;;  %v1205_v61 = vpop.eup %1204  ;;  %v500_v8 = vand.u32 2147483648, %v1459_v33  ;;  %v449_v9 = vsub.f32 1.0, %v448_v59  ;;  %v487_v16 = vor.u32 1.1754944e-38, %v486_v62 }
  0xba   :  { %v1207_v0 = vpop.eup %1206  ;;  %v443_v3 = vrot.slane %v442_v57, 2  ;;  %v465_v4 = vadd.f32 %v1199_v37, %v464_v58  ;;  %v476_v5 = vmul.f32 %v1205_v61, %v1457_v29  ;;  %vm1505_vm10 = vcmp.eq.f32.partialorder %v498_v63, 8.507059e+37 }
  0xbb   :  { %v1487_v2 = vadd.f32 %v438_v55, %v437_v48  ;;  %v490_v7 = vmul.f32 %v1207_v0, %v1459_v33  ;;  %v1501_v15 = vpop.eup %1208  ;;  %vm481_vm11 = vweird.f32 %v1205_v61  ;;  %vm495_vm12 = vweird.f32 %v1207_v0 }
  0xbc   :  { %v444_v10 = vadd.f32 %v443_v3, %v442_v57  ;;  %v469_v11 = vsel %vm468_vm7, %v1199_v37, %v465_v4  ;;  %v477_v14 = vsub.f32 1.0, %v476_v5  ;;  %v450_v26 = vmul.f32 %v1467_v43, %v449_v9  ;;  %vm482_vm13 = vmor %vm480_vm5, %vm481_vm11 }
  0xbd   :  { %1212 = vrcp.f32 %v1487_v2  ;;  %v474_v13 = vsel %vm1473_vm3, %v473_v47, %v469_v11  ;;  %v491_v17 = vsub.f32 1.0, %v490_v7  ;;  %v1512_v23 = vpop.eup %1210  ;;  %v540_v25 = vand.u32 2147483647, %v1487_v2  ;;  %vm496_vm15 = vmor %vm494_vm8, %vm495_vm12 }
  0xbe   :  { %v445_v19 = vrot.slane %v444_v10, 1  ;;  %v1510_v21 = vmul.f32 %v1427_v39, %v474_v13  ;;  %v478_v22 = vmul.f32 %v1205_v61, %v477_v14  ;;  %v501_v30 = vor.u32 1.1754944e-38, %v500_v8 }
  0xbf   :  { %v492_v24 = vmul.f32 %v1207_v0, %v491_v17  ;;  %v451_v32 = vadd.f32 %v1467_v43, %v450_v26  ;;  %vm453_vm14 = vweird.f32 %v1467_v43  ;;  %v504_v34 = vmul.f32 %v1501_v15, %v1462_v38 }
  0xc0   :  { %v1516_v27 = vadd.f32 %v445_v19, %v444_v10  ;;  %v578_v28 = vsel %vm310_vm1, %v1510_v21, 0.0  ;;  %568 = vst.msk [vmem:[#allocation4 + $0x8] sm:$0xff] %vm310_vm1, %v1510_v21  ;;  %v479_v39 = vadd.f32 %v1205_v61, %v478_v22  ;;  %vm536_vm2 = vweird.f32 %v1487_v2  ;;  %vm454_vm4 = vmor %vm452_vm9, %vm453_vm14 }
  0xc1   :  { %579 = vadd.xlane.f32.xlu2 %v578_v28  ;;  %v493_v31 = vadd.f32 %v1207_v0, %v492_v24  ;;  %v542_v29 = vand.u32 2147483648, %v1487_v2  ;;  %vm1537_vm3 = vcmp.eq.f32.partialorder %v540_v25, 8.507059e+37  ;;  %vm457_vm5 = vcmp.eq.f32.partialorder %v456_v52, 8.507059e+37 }
  0xc2   :  { %1214 = vrcp.f32 %v1516_v27  ;;  %v483_v37 = vsel %vm482_vm13, %v1205_v61, %v479_v39  ;;  %v459_v48 = vor.u32 1.1754944e-38, %v458_v54  ;;  %v455_v51 = vsel %vm454_vm4, %v1467_v43, %v451_v32  ;;  %v55_v32 = vld [vmem:[%s1850_s2 + $0x10] sm:$0xff] }
  0xc3   :  { %v1213_v36 = vpop.eup %1212  ;;  %v488_v41 = vsel %vm1490_vm6, %v487_v16, %v483_v37  ;;  %v497_v42 = vsel %vm496_vm15, %v1207_v0, %v493_v31  ;;  %v543_v57 = vor.u32 1.1754944e-38, %v542_v29  ;;  %v554_v58 = vand.u32 2147483647, %v1516_v27  ;;  %v56_v31 = vld [vmem:[%s1850_s2 + $0x18] sm:$0xff]  ;;  %v58_v29 = vld [vmem:[%s1850_s2 + $0x28] sm:$0xff] }
  0xc4   :  { %v532_v45 = vmul.f32 %v1213_v36, %v1487_v2  ;;  %v1542_v47 = vmul.f32 %v1433_v53, %v488_v41  ;;  %v502_v33 = vsel %vm1505_vm10, %v501_v30, %v497_v42  ;;  %v505_v53 = vsub.f32 1.0, %v504_v34  ;;  %767 = vmatpush.msra.mxu1 %v56_v31  ;;  %v57_v41 = vld [vmem:[%s1850_s2 + $0x20] sm:$0xff]  ;;  %v60_v42 = vld [vmem:[%s1850_s2 + $0x38] sm:$0xff]  ;;  %790 = vmatpush.msra.mxu2 %v58_v29 }
  0xc5   :  { %v1553_v49 = vmul.f32 %v1435_v56, %v502_v33  ;;  %v460_v52 = vsel %vm457_vm5, %v459_v48, %v455_v51  ;;  %vm537_vm6 = vweird.f32 %v1213_v36  ;;  %vm509_vm7 = vweird.f32 %v1501_v15  ;;  %813 = vmatpush.msra.mxu3 %v60_v42  ;;  %v71_v42 = vld [vmem:[%s1851_s3 + $0x10] sm:$0xff] }
  0xc6   :  { %v533_v50 = vsub.f32 1.0, %v532_v45  ;;  %v581_v55 = vsel %vm310_vm1, %v1542_v47, 0.0  ;;  %569 = vst.msk [vmem:[#allocation4 + $0x10] sm:$0xff] %vm310_vm1, %v1542_v47  ;;  %v1564_v12 = vmul.f32 %v1425_v35, %v460_v52  ;;  %v506_v43 = vmul.f32 %v1501_v15, %v505_v53  ;;  %vm538_vm9 = vmor %vm536_vm2, %vm537_vm6  ;;  %768 = vmatpush.msra.mxu1 %v55_v32  ;;  %791 = vmatpush.msra.mxu2 %v57_v41  ;;  %v66_v52 = vld [vmem:[%s1850_s2 + $0x68] sm:$0xff] }
  0xc7   :  { %582 = vadd.xlane.f32.xlu0 %v581_v55  ;;  %570 = vst.msk [vmem:[#allocation4 + $0x18] sm:$0xff] %vm310_vm1, %v1553_v49  ;;  %v512_v59 = vand.u32 2147483647, %v1462_v38  ;;  %v514_v61 = vand.u32 2147483648, %v1462_v38  ;;  %v518_v62 = vmul.f32 %v1512_v23, %v1469_v44  ;;  %v556_v3 = vand.u32 2147483648, %v1516_v27 }
  0xc8   :  { %v534_v56 = vmul.f32 %v1213_v36, %v533_v50  ;;  %v1215_v54 = vpop.eup %1214  ;;  %567 = vst.msk [vmem:[#allocation4] sm:$0xff] %vm310_vm1, %v1564_v12  ;;  %vm508_vm8 = vweird.f32 %v1462_v38  ;;  %v507_v35 = vadd.f32 %v1501_v15, %v506_v43  ;;  %vm523_vm13 = vweird.f32 %v1512_v23  ;;  %882 = vmatpush.msrb.mxu2 %v66_v52 }
  0xc9   :  { %v546_v0 = vmul.f32 %v1215_v54, %v1516_v27  ;;  %vm551_vm10 = vweird.f32 %v1215_v54  ;;  %vm513_vm11 = vcmp.eq.f32.partialorder %v512_v59, 8.507059e+37  ;;  %v519_v4 = vsub.f32 1.0, %v518_v62  ;;  %vm510_vm12 = vmor %vm508_vm8, %vm509_vm7  ;;  %v68_v62 = vld [vmem:[%s1850_s2 + $0x78] sm:$0xff] }
  0xca   :  { %v535_v63 = vadd.f32 %v1213_v36, %v534_v56  ;;  %v515_v7 = vor.u32 1.1754944e-38, %v514_v61  ;;  %v511_v38 = vsel %vm510_vm12, %v1501_v15, %v507_v35  ;;  %v526_v9 = vand.u32 2147483647, %v1469_v44  ;;  %v65_v56 = vld [vmem:[%s1850_s2 + $0x60] sm:$0xff]  ;;  %v54_v61 = vld [vmem:[%s1850_s2 + $0x8] sm:$0xff] }
  0xcb   :  { %v547_v6 = vsub.f32 1.0, %v546_v0  ;;  %v520_v2 = vmul.f32 %v1512_v23, %v519_v4  ;;  %v528_v13 = vand.u32 2147483648, %v1469_v44  ;;  %v584_v16 = vsel %vm310_vm1, %v1553_v49, 0.0  ;;  %744 = vmatpush.msra.mxu0 %v54_v61  ;;  %v67_v0 = vld [vmem:[%s1850_s2 + $0x70] sm:$0xff]  ;;  %883 = vmatpush.msrb.mxu2 %v65_v56 }
  0xcc   :  { %v539_v5 = vsel %vm538_vm9, %v1213_v36, %v535_v63  ;;  %v516_v14 = vsel %vm513_vm11, %v515_v7, %v511_v38  ;;  %vm522_vm14 = vweird.f32 %v1469_v44  ;;  %vm550_vm15 = vweird.f32 %v1516_v27  ;;  %v53_v63 = vld [vmem:[%s1850_s2] sm:$0xff] }
  0xcd   :  { %v544_v8 = vsel %vm1537_vm3, %v543_v57, %v539_v5  ;;  %v548_v11 = vmul.f32 %v1215_v54, %v547_v6  ;;  %v1595_v17 = vmul.f32 %v1439_v60, %v516_v14  ;;  %v521_v18 = vadd.f32 %v1512_v23, %v520_v2  ;;  %vm524_vm2 = vmor %vm522_vm14, %vm523_vm13  ;;  %v64_v5 = vld [vmem:[%s1850_s2 + $0x58] sm:$0xff]  ;;  %745 = vmatpush.msra.mxu0 %v53_v63  ;;  %v61_v7 = vld [vmem:[%s1850_s2 + $0x40] sm:$0xff] }
  0xce   :  { %v1589_v10 = vmul.f32 %v1452_v20, %v544_v8  ;;  %v529_v19 = vor.u32 1.1754944e-38, %v528_v13  ;;  %vm552_vm3 = vmor %vm550_vm15, %vm551_vm10  ;;  %v557_v60 = vor.u32 1.1754944e-38, %v556_v3  ;;  %vm527_vm4 = vcmp.eq.f32.partialorder %v526_v9, 8.507059e+37  ;;  %v62_v3 = vld [vmem:[%s1850_s2 + $0x48] sm:$0xff]  ;;  %v63_v8 = vld [vmem:[%s1850_s2 + $0x50] sm:$0xff]  ;;  %859 = vmatpush.msrb.mxu1 %v64_v5 }
  0xcf   :  { %585 = vadd.xlane.f32.xlu0 %v584_v16  ;;  %v549_v20 = vadd.f32 %v1215_v54, %v548_v11  ;;  %571 = vst.msk [vmem:[#allocation4 + $0x20] sm:$0xff] %vm310_vm1, %v1595_v17  ;;  %v525_v44 = vsel %vm524_vm2, %v1512_v23, %v521_v18  ;;  %vm555_vm5 = vcmp.eq.f32.partialorder %v554_v58, 8.507059e+37  ;;  %v587_v28 = vsel %vm310_vm1, %v1595_v17, 0.0  ;;  %v59_v58 = vld [vmem:[%s1850_s2 + $0x30] sm:$0xff]  ;;  %836 = vmatpush.msrb.mxu0 %v62_v3 }
  0xd0   :  { %v593_v15 = vsel %vm310_vm1, %v1589_v10, 0.0  ;;  %573 = vst.msk [vmem:[#allocation4 + $0x30] sm:$0xff] %vm310_vm1, %v1589_v10  ;;  %v530_v24 = vsel %vm527_vm4, %v529_v19, %v525_v44  ;;  %814 = vmatpush.msra.mxu3 %v59_v58  ;;  %860 = vmatpush.msrb.mxu1 %v63_v8 }
  0xd1   :  { %594 = vadd.xlane.f32.xlu1 %v593_v15  ;;  %v553_v22 = vsel %vm552_vm3, %v1215_v54, %v549_v20  ;;  %v1611_v26 = vmul.f32 %v1444_v1, %v530_v24  ;;  %v575_v1 = vsel %vm310_vm1, %v1564_v12, 0.0  ;;  %837 = vmatpush.msrb.mxu0 %v61_v7 }
  0xd2   :  { %v558_v25 = vsel %vm555_vm5, %v557_v60, %v553_v22  ;;  %905 = vmatpush.msrb.mxu3 %v68_v62 }
  0xd3   :  { %v1614_v27 = vmul.f32 %v1464_v40, %v558_v25  ;;  %572 = vst.msk [vmem:[#allocation4 + $0x28] sm:$0xff] %vm310_vm1, %v1611_v26  ;;  %v590_v40 = vsel %vm310_vm1, %v1611_v26, 0.0 }
  0xd4   :  { %906 = vmatpush.msrb.mxu3 %v67_v0 }
  0xd5   :  { %574 = vst.msk [vmem:[#allocation4 + $0x38] sm:$0xff] %vm310_vm1, %v1614_v27  ;;  %v596_v23 = vsel %vm310_vm1, %v1614_v27, 0.0 }
  0xd6   :  { %597 = vadd.xlane.f32.xlu2 %v596_v23 }
  0xd7   :  { %588 = vadd.xlane.f32.xlu0 %v587_v28 }
  0xd9   :  { %576 = vadd.xlane.f32.xlu1 %v575_v1 }
  0xe1   :  { %591 = vadd.xlane.f32.xlu1 %v590_v40 }
 0x134   :  { %v580_v39 = vpop.xlane.xlu2 %579 }
 0x135   :  { %v600_v30 = vadd.f32 1e-08, %v580_v39 }
 0x137   :  { %1216 = vrcp.f32 %v600_v30  ;;  %v630_v48 = vand.u32 2147483647, %v600_v30  ;;  %v632_v50 = vand.u32 2147483648, %v600_v30  ;;  %vm626_vm7 = vweird.f32 %v600_v30 }
 0x139   :  { %v633_v35 = vor.u32 1.1754944e-38, %v632_v50  ;;  %vm631_vm9 = vcmp.eq.f32.partialorder %v630_v48, 8.507059e+37  ;;  %v74_v48 = vld [vmem:[%s1851_s3 + $0x28] sm:$0xff] }
 0x13a   :  { %v583_v34 = vpop.xlane.xlu0 %582 }
 0x13b   :  { %v1634_v36 = vadd.f32 1e-08, %v583_v34 }
 0x13d   :  { %v1217_v37 = vpop.eup %1216  ;;  %1218 = vrcp.f32 %v1634_v36  ;;  %v644_v19 = vand.u32 2147483647, %v1634_v36  ;;  %vm640_vm11 = vweird.f32 %v1634_v36 }
 0x13e   :  { %v622_v45 = vmul.f32 %v1217_v37, %v600_v30  ;;  %vm627_vm6 = vweird.f32 %v1217_v37 }
 0x13f   :  { %vm628_vm8 = vmor %vm626_vm7, %vm627_vm6  ;;  %vm1712_vm12 = vcmp.eq.f32.partialorder %v644_v19, 8.507059e+37 }
 0x140   :  { %v623_v46 = vsub.f32 1.0, %v622_v45 }
 0x142   :  { %v624_v33 = vmul.f32 %v1217_v37, %v623_v46  ;;  %v586_v51 = vpop.xlane.xlu0 %585 }
 0x143   :  { %v1646_v53 = vpop.eup %1218  ;;  %v1648_v55 = vadd.f32 1e-08, %v586_v51 }
 0x144   :  { %v595_v57 = vpop.xlane.xlu1 %594  ;;  %v625_v43 = vadd.f32 %v1217_v37, %v624_v33  ;;  %v636_v54 = vmul.f32 %v1646_v53, %v1634_v36  ;;  %vm641_vm10 = vweird.f32 %v1646_v53 }
 0x145   :  { %v1661_v59 = vadd.f32 1e-08, %v595_v57  ;;  %1220 = vrcp.f32 %v1648_v55  ;;  %v658_v23 = vand.u32 2147483647, %v1648_v55  ;;  %vm1717_vm13 = vmor %vm640_vm11, %vm641_vm10  ;;  %v660_v31 = vand.u32 2147483648, %v1648_v55 }
 0x146   :  { %v637_v4 = vsub.f32 1.0, %v636_v54  ;;  %v629_v6 = vsel %vm628_vm8, %v1217_v37, %v625_v43  ;;  %vm654_vm15 = vweird.f32 %v1648_v55 }
 0x147   :  { %1222 = vrcp.f32 %v1661_v59  ;;  %v634_v38 = vsel %vm631_vm9, %v633_v35, %v629_v6  ;;  %v702_v29 = vand.u32 2147483648, %v1661_v59  ;;  %vm1729_vm2 = vcmp.eq.f32.partialorder %v658_v23, 8.507059e+37 }
 0x148   :  { %v720_v9 = vmul.f32 %v634_v38, %v1510_v21  ;;  %v638_v11 = vmul.f32 %v1646_v53, %v637_v4  ;;  %v646_v21 = vand.u32 2147483648, %v1634_v36  ;;  %v700_v36 = vand.u32 2147483647, %v1661_v59 }
 0x149   :  { %v598_v2 = vpop.xlane.xlu2 %597  ;;  %vm696_vm3 = vweird.f32 %v1661_v59  ;;  %v661_v43 = vor.u32 1.1754944e-38, %v660_v31  ;;  %v703_v61 = vor.u32 1.1754944e-38, %v702_v29 }
 0x14a   :  { %v1692_v14 = vadd.f32 1e-08, %v598_v2  ;;  %v589_v13 = vpop.xlane.xlu0 %588  ;;  %1165 = vmatmul.msk.f32.vlgmr.msra.gmra.mxu1 %vm310_vm1, %v720_v9  ;;  %v639_v22 = vadd.f32 %v1646_v53, %v638_v11  ;;  %v647_v30 = vor.u32 1.1754944e-38, %v646_v21  ;;  %vm1752_vm6 = vcmp.eq.f32.partialorder %v700_v36, 8.507059e+37 }
 0x14b   :  { %v1221_v16 = vpop.eup %1220  ;;  %v1695_v15 = vadd.f32 1e-08, %v589_v13 }
 0x14c   :  { %v577_v18 = vpop.xlane.xlu1 %576  ;;  %v650_v60 = vmul.f32 %v1221_v16, %v1648_v55  ;;  %1224 = vrcp.f32 %v1692_v14  ;;  %vm655_vm14 = vweird.f32 %v1221_v16  ;;  %v643_v41 = vsel %vm1717_vm13, %v1646_v53, %v639_v22 }
 0x14d   :  { %v1697_v20 = vpop.eup %1222  ;;  %v1707_v25 = vadd.f32 1e-08, %v577_v18  ;;  %1226 = vrcp.f32 %v1695_v15  ;;  %vm1737_vm4 = vmor %vm654_vm15, %vm655_vm14  ;;  %v648_v51 = vsel %vm1712_vm12, %v647_v30, %v643_v41  ;;  %vm710_vm9 = vweird.f32 %v1692_v14  ;;  %v70_v41 = vld [vmem:[%s1851_s3 + $0x8] sm:$0xff] }
 0x14e   :  { %v692_v44 = vmul.f32 %v1697_v20, %v1661_v59  ;;  %v651_v24 = vsub.f32 1.0, %v650_v60  ;;  %vm697_vm5 = vweird.f32 %v1697_v20  ;;  %v721_v58 = vmul.f32 %v648_v51, %v1542_v47  ;;  %952 = vmatpush.msra.mxu1 %v70_v41 }
 0x14f   :  { %1228 = vrcp.f32 %v1707_v25  ;;  %vm1759_vm7 = vmor %vm696_vm3, %vm697_vm5  ;;  %v716_v3 = vand.u32 2147483648, %v1692_v14  ;;  %v714_v5 = vand.u32 2147483647, %v1692_v14  ;;  %v616_v38 = vand.u32 2147483647, %v1707_v25 }
 0x150   :  { %v693_v28 = vsub.f32 1.0, %v692_v44  ;;  %v652_v40 = vmul.f32 %v1221_v16, %v651_v24  ;;  %1166 = vmatmul.msk.f32.vlgmr.msra.gmra.mxu2 %vm310_vm1, %v721_v58  ;;  %v618_v2 = vand.u32 2147483648, %v1707_v25  ;;  %vm668_vm12 = vweird.f32 %v1695_v15 }
 0x151   :  { %v717_v18 = vor.u32 1.1754944e-38, %v716_v3  ;;  %vm715_vm13 = vcmp.eq.f32.partialorder %v714_v5, 8.507059e+37  ;;  %vm612_vm14 = vweird.f32 %v1707_v25  ;;  %v672_v21 = vand.u32 2147483647, %v1695_v15  ;;  %975 = vmatpush.msra.mxu2 %v71_v42 }
 0x152   :  { %v694_v32 = vmul.f32 %v1697_v20, %v693_v28  ;;  %v1225_v34 = vpop.eup %1224  ;;  %v653_v37 = vadd.f32 %v1221_v16, %v652_v40  ;;  %v619_v60 = vor.u32 1.1754944e-38, %v618_v2  ;;  %v674_v23 = vand.u32 2147483648, %v1695_v15 }
 0x153   :  { %v706_v45 = vmul.f32 %v1225_v34, %v1692_v14  ;;  %v1735_v33 = vpop.eup %1226  ;;  %vm711_vm8 = vweird.f32 %v1225_v34 }
 0x154   :  { %v592_v46 = vpop.xlane.xlu1 %591  ;;  %v695_v50 = vadd.f32 %v1697_v20, %v694_v32  ;;  %v664_v57 = vmul.f32 %v1735_v33, %v1695_v15  ;;  %v657_v52 = vsel %vm1737_vm4, %v1221_v16, %v653_v37  ;;  %vm1774_vm10 = vmor %vm710_vm9, %vm711_vm8  ;;  %vm669_vm3 = vweird.f32 %v1735_v33 }
 0x155   :  { %v1745_v53 = vadd.f32 1e-08, %v592_v46  ;;  %v707_v55 = vsub.f32 1.0, %v706_v45  ;;  %v1229_v56 = vpop.eup %1228  ;;  %v662_v35 = vsel %vm1729_vm2, %v661_v43, %v657_v52  ;;  %vm617_vm2 = vcmp.eq.f32.partialorder %v616_v38, 8.507059e+37  ;;  %vm670_vm5 = vmor %vm668_vm12, %vm669_vm3  ;;  %v75_v45 = vld [vmem:[%s1851_s3 + $0x30] sm:$0xff]  ;;  %v76_v46 = vld [vmem:[%s1851_s3 + $0x38] sm:$0xff] }
 0x156   :  { %v608_v47 = vmul.f32 %v1229_v56, %v1707_v25  ;;  %v665_v0 = vsub.f32 1.0, %v664_v57  ;;  %v699_v59 = vsel %vm1759_vm7, %v1697_v20, %v695_v50  ;;  %v722_v7 = vmul.f32 %v662_v35, %v1553_v49 }
 0x157   :  { %1230 = vrcp.f32 %v1745_v53  ;;  %v708_v63 = vmul.f32 %v1225_v34, %v707_v55  ;;  %vm613_vm11 = vweird.f32 %v1229_v56  ;;  %v704_v9 = vsel %vm1752_vm6, %v703_v61, %v699_v59 }
 0x158   :  { %v609_v6 = vsub.f32 1.0, %v608_v47  ;;  %v666_v13 = vmul.f32 %v1735_v33, %v665_v0  ;;  %1167 = vmatmul.msk.f32.vlgmr.msra.gmra.mxu3 %vm310_vm1, %v722_v7  ;;  %v725_v14 = vmul.f32 %v704_v9, %v1589_v10  ;;  %vm614_vm15 = vmor %vm612_vm14, %vm613_vm11  ;;  %v686_v25 = vand.u32 2147483647, %v1745_v53 }
 0x159   :  { %v709_v4 = vadd.f32 %v1225_v34, %v708_v63  ;;  %v688_v28 = vand.u32 2147483648, %v1745_v53  ;;  %vm682_vm6 = vweird.f32 %v1745_v53  ;;  %vm673_vm8 = vcmp.eq.f32.partialorder %v672_v21, 8.507059e+37 }
 0x15a   :  { %v610_v11 = vmul.f32 %v1229_v56, %v609_v6  ;;  %v667_v44 = vadd.f32 %v1735_v33, %v666_v13  ;;  %1170 = vmatmul.msk.f32.vlgmr.msrb.gmra.mxu2 %vm310_vm1, %v725_v14  ;;  %vm687_vm9 = vcmp.eq.f32.partialorder %v686_v25, 8.507059e+37 }
 0x15b   :  { %v713_v49 = vsel %vm1774_vm10, %v1225_v34, %v709_v4  ;;  %v675_v34 = vor.u32 1.1754944e-38, %v674_v23  ;;  %v689_v37 = vor.u32 1.1754944e-38, %v688_v28  ;;  %1067 = vmatpush.msrb.mxu2 %v75_v45 }
 0x15c   :  { %v611_v20 = vadd.f32 %v1229_v56, %v610_v11  ;;  %v718_v10 = vsel %vm715_vm13, %v717_v18, %v713_v49  ;;  %v671_v32 = vsel %vm670_vm5, %v1735_v33, %v667_v44  ;;  %v73_v33 = vld [vmem:[%s1851_s3 + $0x20] sm:$0xff] }
 0x15d   :  { %v1231_v16 = vpop.eup %1230  ;;  %v726_v30 = vmul.f32 %v718_v10, %v1614_v27  ;;  %v676_v36 = vsel %vm673_vm8, %v675_v34, %v671_v32 }
 0x15e   :  { %v678_v19 = vmul.f32 %v1231_v16, %v1745_v53  ;;  %v615_v24 = vsel %vm614_vm15, %v1229_v56, %v611_v20  ;;  %vm683_vm4 = vweird.f32 %v1231_v16  ;;  %v723_v29 = vmul.f32 %v676_v36, %v1595_v17  ;;  %v69_v17 = vld [vmem:[%s1851_s3] sm:$0xff] }
 0x15f   :  { %v620_v1 = vsel %vm617_vm2, %v619_v60, %v615_v24  ;;  %vm684_vm7 = vmor %vm682_vm6, %vm683_vm4 }
 0x160   :  { %v679_v22 = vsub.f32 1.0, %v678_v19  ;;  %v719_v39 = vmul.f32 %v620_v1, %v1564_v12  ;;  %1171 = vmatmul.msk.f32.vlgmr.msrb.gmra.mxu3 %vm310_vm1, %v726_v30 }
 0x162   :  { %v680_v40 = vmul.f32 %v1231_v16, %v679_v22  ;;  %1164 = vmatmul.msk.f32.vlgmr.msra.gmra.mxu0 %vm310_vm1, %v719_v39 }
 0x163   :  { %929 = vmatpush.msra.mxu0 %v69_v17 }
 0x164   :  { %v681_v31 = vadd.f32 %v1231_v16, %v680_v40 }
 0x166   :  { %v685_v12 = vsel %vm684_vm7, %v1231_v16, %v681_v31 }
 0x167   :  { %v690_v27 = vsel %vm687_vm9, %v689_v37, %v685_v12 }
 0x168   :  { %v724_v15 = vmul.f32 %v690_v27, %v1611_v26  ;;  %v72_v26 = vld [vmem:[%s1851_s3 + $0x18] sm:$0xff]  ;;  %s1284_s3 = smov [#allocation4]  }
 0x169   :  { %998 = vmatpush.msra.mxu3 %v72_v26  ;;  %s1121_s9 = sshll.u32 %s1284_s3, 4  ;;  %s1122_s9 = int_to_ptr.vmem [resolvable:$true] %s1121_s9 }
 0x16a   :  { %1169 = vmatmul.msk.f32.vlgmr.msrb.gmra.mxu1 %vm310_vm1, %v724_v15  ;;  %1168 = vmatmul.msk.f32.vlgmr.msrb.gmra.mxu0 %vm310_vm1, %v723_v29  ;;  %1129 = dma.vmem_to_hbm [thread:$0]  %s1122_s9, 1024, %s1124_s12, [#allocation5], %s1285_s13, %s1285_s13, %s1286_s14   ;;  %vm1101_vm1 = vcmask 261120  }
 0x16b   :  { %1090 = vmatpush.msrb.mxu3 %v76_v46  ;;  %1021 = vmatpush.msrb.mxu0 %v73_v33 }
 0x16c   :  { %1044 = vmatpush.msrb.mxu1 %v74_v48 }
 0x1c7   :  { %v770_v50 = vpop.f32.mrf.mxu1 }
 0x1c8   :  { %1173 = vmatmul.msk.f32.vlgmr.msra.gmra.mxu1 %vm77_vm0, %v770_v50 }
 0x1d3   :  { %v793_v51 = vpop.f32.mrf.mxu2 }
 0x1d4   :  { %1174 = vmatmul.msk.f32.vlgmr.msra.gmra.mxu2 %vm77_vm0, %v793_v51 }
 0x1db   :  { %v816_v53 = vpop.f32.mrf.mxu3 }
 0x1dc   :  { %1175 = vmatmul.msk.f32.vlgmr.msra.gmra.mxu3 %vm77_vm0, %v816_v53 }
 0x1dd   :  { %v885_v57 = vpop.f32.mrf.mxu2 }
 0x1de   :  { %1178 = vmatmul.msk.f32.vlgmr.msrb.gmra.mxu2 %vm77_vm0, %v885_v57 }
 0x1df   :  { %v747_v55 = vpop.f32.mrf.mxu0 }
 0x1e0   :  { %1172 = vmatmul.msk.f32.vlgmr.msra.gmra.mxu0 %vm77_vm0, %v747_v55 }
 0x1e3   :  { %v908_v58 = vpop.f32.mrf.mxu3 }
 0x1e4   :  { %1179 = vmatmul.msk.f32.vlgmr.msrb.gmra.mxu3 %vm77_vm0, %v908_v58 }
 0x1e7   :  { %v862_v52 = vpop.f32.mrf.mxu1  ;;  %v839_v56 = vpop.f32.mrf.mxu0 }
 0x1e8   :  { %1177 = vmatmul.msk.f32.vlgmr.msrb.gmra.mxu1 %vm77_vm0, %v862_v52  ;;  %1176 = vmatmul.msk.f32.vlgmr.msrb.gmra.mxu0 %vm77_vm0, %v839_v56 }
 0x245   :  { %v954_v43 = vpop.f32.mrf.mxu1 }
 0x257   :  { %v977_v54 = vpop.f32.mrf.mxu2 }
 0x25d   :  { %v931_v61 = vpop.f32.mrf.mxu0 }
 0x25e   :  { %v1095_v62 = vadd.f32 %v954_v43, %v931_v61 }
 0x25f   :  { %v1000_v47 = vpop.f32.mrf.mxu3 }
 0x260   :  { %v1097_v63 = vadd.f32 %v1095_v62, %v977_v54 }
 0x261   :  { %v1069_v4 = vpop.f32.mrf.mxu2 }
 0x262   :  { %v1099_v0 = vadd.f32 %v1097_v63, %v1000_v47 }
 0x264   :  { %1102 = vst.msk [vmem:[#allocation2] sm:$0xff] %vm1101_vm1, %v1099_v0 }
 0x265   :  { %v1046_v3 = vpop.f32.mrf.mxu1  ;;  %v1023_v35 = vpop.f32.mrf.mxu0 }
 0x266   :  { %v1096_v59 = vadd.f32 %v1046_v3, %v1023_v35 }
 0x267   :  { %v1092_v6 = vpop.f32.mrf.mxu3 }
 0x268   :  { %v1098_v5 = vadd.f32 %v1096_v59, %v1069_v4 }
 0x26a   :  { %v1100_v7 = vadd.f32 %v1098_v5, %v1092_v6 }
 0x26c   :  { %1103 = vst.msk [vmem:[#allocation2 + $0x8] sm:$0xff] %vm1101_vm1, %v1100_v7 }
 0x26d   :  { %1116 = dma.vmem_to_hbm [thread:$0]  %s1109_s5, 256, %s1111_s16, [#allocation3], %s1285_s13, %s1285_s13, %s1286_s14  }
 0x26e   :  { %1280 = dma.done.wait [#allocation3], 256  }
 0x26f   :  { %1281 = vsyncadd [#allocation3], 4294967040 }
 0x270   :  { %1282 = dma.done.wait [#allocation5], 1024  }
 0x271   :  { %1283 = vsyncadd [#allocation5], 4294966272 }
 0x272   :  { %1138 = vsyncpa [#allocation3], 1 }
 0x273   :  { %1139 = vsyncpa [#allocation5], 1 }

</bundles_post_ra>
